<compile_context>
chip_gen: v7x
topology: tpu7x:2x2x1
jax: 0.10.0
libtpu: 0.0.40
codegen_flags: <defaults>
</compile_context>

<pallas_src>
import math

import jax
import jax.numpy as jnp
from jax.experimental import pallas as pl
from jax.experimental.pallas import tpu as pltpu  # noqa: F401  (kept for future tiling/params)

# ----- config (small, consistent with the LLMConfig fields used in forward) -----
BATCH = 2          # cfg.batch_size
SEQ = 8            # cfg.prefill_size
EMB = 32           # cfg.embedding_dim
NUM_HEAD = 4       # cfg.num_head
HEAD_SIZE = 8      # cfg.head_size  (EMB == NUM_HEAD * HEAD_SIZE)
DIM_FF = 64        # cfg.dim_ff
LN_EPS = 1e-5


def _layer_norm(x, gamma, beta):
    mu = jnp.mean(x, axis=-1, keepdims=True)
    var = jnp.mean((x - mu) ** 2, axis=-1, keepdims=True)
    return (x - mu) * jax.lax.rsqrt(var + LN_EPS) * gamma + beta


def block_kernel(x_ref,
                 wqkv_ref, wo_ref,
                 w1_ref, b1_ref, w2_ref, b2_ref,
                 g1_ref, be1_ref, g2_ref, be2_ref,
                 o_ref):
    B, L, E = x_ref.shape
    H, D = NUM_HEAD, HEAD_SIZE

    x3 = x_ref[...]                        # (B, L, E)
    x = x3.reshape(B * L, E)               # collapse leading dims -> (16, 32)

    # ---- LayerNorm 1 + fused QKV projection ----
    xn = _layer_norm(x, g1_ref[...], be1_ref[...])
    qkv = jnp.dot(xn, wqkv_ref[...], preferred_element_type=jnp.float32)  # (B*L, 3E)
    qkv3 = qkv.reshape(B, L, 3 * E)        # (B, L, 3E) for batched attention

    # scale q once on the whole slab (instead of per head / per score matrix)
    inv_sqrt_d = 1.0 / math.sqrt(D)
    q_all = qkv3[:, :, 0 * E:1 * E] * inv_sqrt_d   # (B, L, E)
    k_all = qkv3[:, :, 1 * E:2 * E]                # (B, L, E)
    v_all = qkv3[:, :, 2 * E:3 * E]                # (B, L, E)

    # additive causal-mask bias, hoisted once (no -inf / where on the data path)
    row = jax.lax.broadcasted_iota(jnp.int32, (L, L), 0)
    col = jax.lax.broadcasted_iota(jnp.int32, (L, L), 1)
    bias = jnp.where(col <= row, 0.0, -1e30).astype(jnp.float32)[None]    # (1, L, L)

    # ---- multi-head causal self-attention (static unroll over heads,
    #      each einsum batched over the B dimension) ----
    head_outs = []
    for h in range(H):
        qh = q_all[:, :, h * D:(h + 1) * D]        # (B, L, D)
        kh = k_all[:, :, h * D:(h + 1) * D]        # (B, L, D)
        vh = v_all[:, :, h * D:(h + 1) * D]        # (B, L, D)

        s = jnp.einsum('bld,bmd->blm', qh, kh,
                       preferred_element_type=jnp.float32) + bias
        # manual softmax: exp -> EUP, reciprocal -> EUP, reductions -> XLU
        m = jnp.max(s, axis=-1, keepdims=True)
        p = jnp.exp(s - m)
        denom = jnp.sum(p, axis=-1, keepdims=True)
        p = p * pl.reciprocal(denom, approx=True)
        head_outs.append(jnp.einsum('blm,bmd->bld', p, vh,
                                    preferred_element_type=jnp.float32))

    attn = jnp.concatenate(head_outs, axis=-1)             # (B, L, E)
    attn2 = attn.reshape(B * L, E)

    sa = jnp.dot(attn2, wo_ref[...], preferred_element_type=jnp.float32)
    x1 = x + sa                                            # residual 1

    # ---- LayerNorm 2 + feed-forward (Linear -> ReLU -> Linear) ----
    xn2 = _layer_norm(x1, g2_ref[...], be2_ref[...])
    h1 = jnp.dot(xn2, w1_ref[...], preferred_element_type=jnp.float32) + b1_ref[...]
    h1 = jnp.maximum(h1, 0.0)
    ff = jnp.dot(h1, w2_ref[...], preferred_element_type=jnp.float32) + b2_ref[...]

    y = x1 + ff                                            # residual 2
    o_ref[...] = y.reshape(B, L, E).astype(o_ref.dtype)


def transformer_block(x, params):
    (wq, wk, wv, wo, w1, b1, w2, b2, g1, be1, g2, be2) = params
    wqkv = jnp.concatenate([wq, wk, wv], axis=1)           # (E, 3E) fused QKV weight
    B, L, E = x.shape
    # Single kernel invocation: no grid, all operands resident in VMEM
    # (total footprint ~30 KB, far below the scoped VMEM limit on v5e/v6e/v7x).
    return pl.pallas_call(
        block_kernel,
        out_shape=jax.ShapeDtypeStruct((B, L, E), jnp.float32),
    )(x, wqkv, wo, w1, b1, w2, b2, g1, be1, g2, be2)


# ---------------- pure-JAX reference (for correctness check) ----------------
def reference_block(x, params):
    (wq, wk, wv, wo, w1, b1, w2, b2, g1, be1, g2, be2) = params
    xn = _layer_norm(x, g1, be1)
    q = xn @ wq
    k = xn @ wk
    v = xn @ wv
    B, L, E = x.shape
    qh = q.reshape(B, L, NUM_HEAD, HEAD_SIZE).transpose(0, 2, 1, 3)
    kh = k.reshape(B, L, NUM_HEAD, HEAD_SIZE).transpose(0, 2, 1, 3)
    vh = v.reshape(B, L, NUM_HEAD, HEAD_SIZE).transpose(0, 2, 1, 3)
    att = jnp.einsum('bhqd,bhkd->bhqk', qh, kh) / math.sqrt(HEAD_SIZE)
    mask = jnp.tril(jnp.ones((L, L), bool))
    att = jnp.where(mask, att, -jnp.inf)
    att = jax.nn.softmax(att, axis=-1)
    out = jnp.einsum('bhqk,bhkd->bhqd', att, vh).transpose(0, 2, 1, 3).reshape(B, L, E)
    x1 = x + out @ wo
    xn2 = _layer_norm(x1, g2, be2)
    ff = jnp.maximum(xn2 @ w1 + b1, 0.0) @ w2 + b2
    return x1 + ff


def init_params(key):
    ks = jax.random.split(key, 6)
    scale = 0.02
    wq = scale * jax.random.normal(ks[0], (EMB, EMB), jnp.float32)
    wk = scale * jax.random.normal(ks[1], (EMB, EMB), jnp.float32)
    wv = scale * jax.random.normal(ks[2], (EMB, EMB), jnp.float32)
    wo = scale * jax.random.normal(ks[3], (EMB, EMB), jnp.float32)
    w1 = scale * jax.random.normal(ks[4], (EMB, DIM_FF), jnp.float32)
    b1 = jnp.zeros((1, DIM_FF), jnp.float32)
    w2 = scale * jax.random.normal(ks[5], (DIM_FF, EMB), jnp.float32)
    b2 = jnp.zeros((1, EMB), jnp.float32)
    g1 = jnp.ones((1, EMB), jnp.float32)    # nn.LayerNorm default init
    be1 = jnp.zeros((1, EMB), jnp.float32)
    g2 = jnp.ones((1, EMB), jnp.float32)
    be2 = jnp.zeros((1, EMB), jnp.float32)
    return (wq, wk, wv, wo, w1, b1, w2, b2, g1, be1, g2, be2)


if __name__ == "__main__":
    key = jax.random.PRNGKey(0)
    kx, kp = jax.random.split(key)
    x = jax.random.normal(kx, (BATCH, SEQ, EMB), jnp.float32)
    params = init_params(kp)

    out = transformer_block(x, params)
    out = jax.block_until_ready(out)

    ref = reference_block(x, params)
    assert out.shape == (BATCH, SEQ, EMB)
    # slightly looser tolerance because the kernel uses the EUP approximate
    # reciprocal for the softmax denominator.
    assert jnp.allclose(out, ref, atol=1e-3, rtol=1e-3), "mismatch vs reference"
    # TODO(synk): dropout (p=0.3) is treated as eval-mode identity; training-mode RNG dropout not implemented.
    print("KERNEL_OK")
</pallas_src>

<mosaic_0001>
module attributes {stable_mosaic.version = 11 : i64} {
  func.func @block_kernel(%arg0: memref<2x8x32xf32, #tpu.memory_space<vmem>>, %arg1: memref<32x96xf32, #tpu.memory_space<vmem>>, %arg2: memref<32x32xf32, #tpu.memory_space<vmem>>, %arg3: memref<32x64xf32, #tpu.memory_space<vmem>>, %arg4: memref<1x64xf32, #tpu.memory_space<vmem>>, %arg5: memref<64x32xf32, #tpu.memory_space<vmem>>, %arg6: memref<1x32xf32, #tpu.memory_space<vmem>>, %arg7: memref<1x32xf32, #tpu.memory_space<vmem>>, %arg8: memref<1x32xf32, #tpu.memory_space<vmem>>, %arg9: memref<1x32xf32, #tpu.memory_space<vmem>>, %arg10: memref<1x32xf32, #tpu.memory_space<vmem>>, %arg11: memref<2x8x32xf32, #tpu.memory_space<vmem>>) attributes {dimension_semantics = [], scalar_prefetch = 0 : i64, scratch_operands = 0 : i64, tpu.core_type = #tpu.core_type<tc>} {
    %c0 = arith.constant 0 : index
    %c0_0 = arith.constant 0 : index
    %c0_1 = arith.constant 0 : index
    %0 = vector.load %arg0[%c0, %c0_0, %c0_1] : memref<2x8x32xf32, #tpu.memory_space<vmem>>, vector<2x8x32xf32>
    %1 = vector.shape_cast %0 : vector<2x8x32xf32> to vector<16x32xf32>
    %c0_2 = arith.constant 0 : index
    %c0_3 = arith.constant 0 : index
    %2 = vector.load %arg7[%c0_2, %c0_3] : memref<1x32xf32, #tpu.memory_space<vmem>>, vector<1x32xf32>
    %c0_4 = arith.constant 0 : index
    %c0_5 = arith.constant 0 : index
    %3 = vector.load %arg8[%c0_4, %c0_5] : memref<1x32xf32, #tpu.memory_space<vmem>>, vector<1x32xf32>
    %cst = arith.constant dense<0.000000e+00> : vector<16xf32>
    %4 = vector.multi_reduction <add>, %1, %cst [1] : vector<16x32xf32> to vector<16xf32>
    %5 = vector.shape_cast %4 : vector<16xf32> to vector<16x1xf32>
    %cst_6 = arith.constant 3.200000e+01 : f32
    %6 = vector.broadcast %cst_6 : f32 to vector<16x1xf32>
    %7 = arith.divf %5, %6 : vector<16x1xf32>
    %8 = vector.broadcast %7 : vector<16x1xf32> to vector<16x32xf32>
    %9 = arith.subf %1, %8 : vector<16x32xf32>
    %10 = arith.mulf %9, %9 : vector<16x32xf32>
    %cst_7 = arith.constant dense<0.000000e+00> : vector<16xf32>
    %11 = vector.multi_reduction <add>, %10, %cst_7 [1] : vector<16x32xf32> to vector<16xf32>
    %12 = vector.shape_cast %11 : vector<16xf32> to vector<16x1xf32>
    %cst_8 = arith.constant 3.200000e+01 : f32
    %13 = vector.broadcast %cst_8 : f32 to vector<16x1xf32>
    %14 = arith.divf %12, %13 : vector<16x1xf32>
    %15 = vector.broadcast %7 : vector<16x1xf32> to vector<16x32xf32>
    %16 = arith.subf %1, %15 : vector<16x32xf32>
    %cst_9 = arith.constant 9.99999974E-6 : f32
    %17 = vector.broadcast %cst_9 : f32 to vector<16x1xf32>
    %18 = arith.addf %14, %17 : vector<16x1xf32>
    %19 = math.rsqrt %18 : vector<16x1xf32>
    %20 = vector.broadcast %19 : vector<16x1xf32> to vector<16x32xf32>
    %21 = arith.mulf %16, %20 : vector<16x32xf32>
    %22 = vector.broadcast %2 : vector<1x32xf32> to vector<16x32xf32>
    %23 = arith.mulf %21, %22 : vector<16x32xf32>
    %24 = vector.broadcast %3 : vector<1x32xf32> to vector<16x32xf32>
    %25 = arith.addf %23, %24 : vector<16x32xf32>
    %c0_10 = arith.constant 0 : index
    %c0_11 = arith.constant 0 : index
    %26 = vector.load %arg1[%c0_10, %c0_11] : memref<32x96xf32, #tpu.memory_space<vmem>>, vector<32x96xf32>
    %cst_12 = arith.constant dense<0.000000e+00> : vector<16x96xf32>
    %27 = tpu.matmul %25, %26, %cst_12 {dimension_numbers = #tpu.dot_dimension_numbers<[1], [0], [0], [1], [0, 0, 1, 1], [], []>} : vector<16x32xf32>, vector<32x96xf32>, vector<16x96xf32> -> vector<16x96xf32>
    %28 = vector.shape_cast %27 : vector<16x96xf32> to vector<2x8x96xf32>
    %29 = vector.extract_strided_slice %28 {offsets = [0, 0, 0], sizes = [2, 8, 32], strides = [1, 1, 1]} : vector<2x8x96xf32> to vector<2x8x32xf32>
    %cst_13 = arith.constant 0.353553385 : f32
    %30 = vector.broadcast %cst_13 : f32 to vector<2x8x32xf32>
    %31 = arith.mulf %29, %30 : vector<2x8x32xf32>
    %32 = vector.extract_strided_slice %28 {offsets = [0, 0, 32], sizes = [2, 8, 32], strides = [1, 1, 1]} : vector<2x8x96xf32> to vector<2x8x32xf32>
    %33 = vector.extract_strided_slice %28 {offsets = [0, 0, 64], sizes = [2, 8, 32], strides = [1, 1, 1]} : vector<2x8x96xf32> to vector<2x8x32xf32>
    %34 = tpu.iota {dimensions = array<i32: 0>} : vector<8x8xi32>
    %35 = tpu.iota {dimensions = array<i32: 1>} : vector<8x8xi32>
    %36 = arith.cmpi sle, %35, %34 : vector<8x8xi32>
    %cst_14 = arith.constant 0.000000e+00 : f32
    %cst_15 = arith.constant -1.000000e+30 : f32
    %37 = vector.broadcast %cst_14 : f32 to vector<8x8xf32>
    %38 = vector.broadcast %cst_15 : f32 to vector<8x8xf32>
    %39 = arith.select %36, %37, %38 : vector<8x8xi1>, vector<8x8xf32>
    %40 = vector.shape_cast %39 : vector<8x8xf32> to vector<1x8x8xf32>
    %41 = vector.extract_strided_slice %31 {offsets = [0, 0, 0], sizes = [2, 8, 8], strides = [1, 1, 1]} : vector<2x8x32xf32> to vector<2x8x8xf32>
    %42 = vector.extract_strided_slice %32 {offsets = [0, 0, 0], sizes = [2, 8, 8], strides = [1, 1, 1]} : vector<2x8x32xf32> to vector<2x8x8xf32>
    %43 = vector.extract_strided_slice %33 {offsets = [0, 0, 0], sizes = [2, 8, 8], strides = [1, 1, 1]} : vector<2x8x32xf32> to vector<2x8x8xf32>
    "tpu.trace_start"() <{level = 10 : i32, message = "bld,bmd->blm"}> : () -> ()
    %cst_16 = arith.constant dense<0.000000e+00> : vector<2x8x8xf32>
    %44 = tpu.matmul %41, %42, %cst_16 {dimension_numbers = #tpu.dot_dimension_numbers<[2], [2], [1], [1], [0, 0, 0, 1, 1, 1], [0], [0]>} : vector<2x8x8xf32>, vector<2x8x8xf32>, vector<2x8x8xf32> -> vector<2x8x8xf32>
    "tpu.trace_stop"() : () -> ()
    %45 = vector.broadcast %40 : vector<1x8x8xf32> to vector<2x8x8xf32>
    %46 = arith.addf %44, %45 : vector<2x8x8xf32>
    %cst_17 = arith.constant dense<0xFF800000> : vector<2x8xf32>
    %47 = vector.multi_reduction <maximumf>, %46, %cst_17 [2] : vector<2x8x8xf32> to vector<2x8xf32>
    %48 = vector.shape_cast %47 : vector<2x8xf32> to vector<2x8x1xf32>
    %49 = vector.broadcast %48 : vector<2x8x1xf32> to vector<2x8x8xf32>
    %50 = arith.subf %46, %49 : vector<2x8x8xf32>
    %51 = math.exp %50 : vector<2x8x8xf32>
    %cst_18 = arith.constant dense<0.000000e+00> : vector<2x8xf32>
    %52 = vector.multi_reduction <add>, %51, %cst_18 [2] : vector<2x8x8xf32> to vector<2x8xf32>
    %53 = vector.shape_cast %52 : vector<2x8xf32> to vector<2x8x1xf32>
    %54 = tpu.reciprocal %53 {approx = true} : vector<2x8x1xf32> -> vector<2x8x1xf32>
    %55 = vector.broadcast %54 : vector<2x8x1xf32> to vector<2x8x8xf32>
    %56 = arith.mulf %51, %55 : vector<2x8x8xf32>
    "tpu.trace_start"() <{level = 10 : i32, message = "blm,bmd->bld"}> : () -> ()
    %cst_19 = arith.constant dense<0.000000e+00> : vector<2x8x8xf32>
    %57 = tpu.matmul %56, %43, %cst_19 {dimension_numbers = #tpu.dot_dimension_numbers<[2], [1], [1], [2], [0, 0, 0, 1, 1, 2], [0], [0]>} : vector<2x8x8xf32>, vector<2x8x8xf32>, vector<2x8x8xf32> -> vector<2x8x8xf32>
    "tpu.trace_stop"() : () -> ()
    %58 = vector.extract_strided_slice %31 {offsets = [0, 0, 8], sizes = [2, 8, 8], strides = [1, 1, 1]} : vector<2x8x32xf32> to vector<2x8x8xf32>
    %59 = vector.extract_strided_slice %32 {offsets = [0, 0, 8], sizes = [2, 8, 8], strides = [1, 1, 1]} : vector<2x8x32xf32> to vector<2x8x8xf32>
    %60 = vector.extract_strided_slice %33 {offsets = [0, 0, 8], sizes = [2, 8, 8], strides = [1, 1, 1]} : vector<2x8x32xf32> to vector<2x8x8xf32>
    "tpu.trace_start"() <{level = 10 : i32, message = "bld,bmd->blm"}> : () -> ()
    %cst_20 = arith.constant dense<0.000000e+00> : vector<2x8x8xf32>
    %61 = tpu.matmul %58, %59, %cst_20 {dimension_numbers = #tpu.dot_dimension_numbers<[2], [2], [1], [1], [0, 0, 0, 1, 1, 1], [0], [0]>} : vector<2x8x8xf32>, vector<2x8x8xf32>, vector<2x8x8xf32> -> vector<2x8x8xf32>
    "tpu.trace_stop"() : () -> ()
    %62 = vector.broadcast %40 : vector<1x8x8xf32> to vector<2x8x8xf32>
    %63 = arith.addf %61, %62 : vector<2x8x8xf32>
    %cst_21 = arith.constant dense<0xFF800000> : vector<2x8xf32>
    %64 = vector.multi_reduction <maximumf>, %63, %cst_21 [2] : vector<2x8x8xf32> to vector<2x8xf32>
    %65 = vector.shape_cast %64 : vector<2x8xf32> to vector<2x8x1xf32>
    %66 = vector.broadcast %65 : vector<2x8x1xf32> to vector<2x8x8xf32>
    %67 = arith.subf %63, %66 : vector<2x8x8xf32>
    %68 = math.exp %67 : vector<2x8x8xf32>
    %cst_22 = arith.constant dense<0.000000e+00> : vector<2x8xf32>
    %69 = vector.multi_reduction <add>, %68, %cst_22 [2] : vector<2x8x8xf32> to vector<2x8xf32>
    %70 = vector.shape_cast %69 : vector<2x8xf32> to vector<2x8x1xf32>
    %71 = tpu.reciprocal %70 {approx = true} : vector<2x8x1xf32> -> vector<2x8x1xf32>
    %72 = vector.broadcast %71 : vector<2x8x1xf32> to vector<2x8x8xf32>
    %73 = arith.mulf %68, %72 : vector<2x8x8xf32>
    "tpu.trace_start"() <{level = 10 : i32, message = "blm,bmd->bld"}> : () -> ()
    %cst_23 = arith.constant dense<0.000000e+00> : vector<2x8x8xf32>
    %74 = tpu.matmul %73, %60, %cst_23 {dimension_numbers = #tpu.dot_dimension_numbers<[2], [1], [1], [2], [0, 0, 0, 1, 1, 2], [0], [0]>} : vector<2x8x8xf32>, vector<2x8x8xf32>, vector<2x8x8xf32> -> vector<2x8x8xf32>
    "tpu.trace_stop"() : () -> ()
    %75 = vector.extract_strided_slice %31 {offsets = [0, 0, 16], sizes = [2, 8, 8], strides = [1, 1, 1]} : vector<2x8x32xf32> to vector<2x8x8xf32>
    %76 = vector.extract_strided_slice %32 {offsets = [0, 0, 16], sizes = [2, 8, 8], strides = [1, 1, 1]} : vector<2x8x32xf32> to vector<2x8x8xf32>
    %77 = vector.extract_strided_slice %33 {offsets = [0, 0, 16], sizes = [2, 8, 8], strides = [1, 1, 1]} : vector<2x8x32xf32> to vector<2x8x8xf32>
    "tpu.trace_start"() <{level = 10 : i32, message = "bld,bmd->blm"}> : () -> ()
    %cst_24 = arith.constant dense<0.000000e+00> : vector<2x8x8xf32>
    %78 = tpu.matmul %75, %76, %cst_24 {dimension_numbers = #tpu.dot_dimension_numbers<[2], [2], [1], [1], [0, 0, 0, 1, 1, 1], [0], [0]>} : vector<2x8x8xf32>, vector<2x8x8xf32>, vector<2x8x8xf32> -> vector<2x8x8xf32>
    "tpu.trace_stop"() : () -> ()
    %79 = vector.broadcast %40 : vector<1x8x8xf32> to vector<2x8x8xf32>
    %80 = arith.addf %78, %79 : vector<2x8x8xf32>
    %cst_25 = arith.constant dense<0xFF800000> : vector<2x8xf32>
    %81 = vector.multi_reduction <maximumf>, %80, %cst_25 [2] : vector<2x8x8xf32> to vector<2x8xf32>
    %82 = vector.shape_cast %81 : vector<2x8xf32> to vector<2x8x1xf32>
    %83 = vector.broadcast %82 : vector<2x8x1xf32> to vector<2x8x8xf32>
    %84 = arith.subf %80, %83 : vector<2x8x8xf32>
    %85 = math.exp %84 : vector<2x8x8xf32>
    %cst_26 = arith.constant dense<0.000000e+00> : vector<2x8xf32>
    %86 = vector.multi_reduction <add>, %85, %cst_26 [2] : vector<2x8x8xf32> to vector<2x8xf32>
    %87 = vector.shape_cast %86 : vector<2x8xf32> to vector<2x8x1xf32>
    %88 = tpu.reciprocal %87 {approx = true} : vector<2x8x1xf32> -> vector<2x8x1xf32>
    %89 = vector.broadcast %88 : vector<2x8x1xf32> to vector<2x8x8xf32>
    %90 = arith.mulf %85, %89 : vector<2x8x8xf32>
    "tpu.trace_start"() <{level = 10 : i32, message = "blm,bmd->bld"}> : () -> ()
    %cst_27 = arith.constant dense<0.000000e+00> : vector<2x8x8xf32>
    %91 = tpu.matmul %90, %77, %cst_27 {dimension_numbers = #tpu.dot_dimension_numbers<[2], [1], [1], [2], [0, 0, 0, 1, 1, 2], [0], [0]>} : vector<2x8x8xf32>, vector<2x8x8xf32>, vector<2x8x8xf32> -> vector<2x8x8xf32>
    "tpu.trace_stop"() : () -> ()
    %92 = vector.extract_strided_slice %31 {offsets = [0, 0, 24], sizes = [2, 8, 8], strides = [1, 1, 1]} : vector<2x8x32xf32> to vector<2x8x8xf32>
    %93 = vector.extract_strided_slice %32 {offsets = [0, 0, 24], sizes = [2, 8, 8], strides = [1, 1, 1]} : vector<2x8x32xf32> to vector<2x8x8xf32>
    %94 = vector.extract_strided_slice %33 {offsets = [0, 0, 24], sizes = [2, 8, 8], strides = [1, 1, 1]} : vector<2x8x32xf32> to vector<2x8x8xf32>
    "tpu.trace_start"() <{level = 10 : i32, message = "bld,bmd->blm"}> : () -> ()
    %cst_28 = arith.constant dense<0.000000e+00> : vector<2x8x8xf32>
    %95 = tpu.matmul %92, %93, %cst_28 {dimension_numbers = #tpu.dot_dimension_numbers<[2], [2], [1], [1], [0, 0, 0, 1, 1, 1], [0], [0]>} : vector<2x8x8xf32>, vector<2x8x8xf32>, vector<2x8x8xf32> -> vector<2x8x8xf32>
    "tpu.trace_stop"() : () -> ()
    %96 = vector.broadcast %40 : vector<1x8x8xf32> to vector<2x8x8xf32>
    %97 = arith.addf %95, %96 : vector<2x8x8xf32>
    %cst_29 = arith.constant dense<0xFF800000> : vector<2x8xf32>
    %98 = vector.multi_reduction <maximumf>, %97, %cst_29 [2] : vector<2x8x8xf32> to vector<2x8xf32>
    %99 = vector.shape_cast %98 : vector<2x8xf32> to vector<2x8x1xf32>
    %100 = vector.broadcast %99 : vector<2x8x1xf32> to vector<2x8x8xf32>
    %101 = arith.subf %97, %100 : vector<2x8x8xf32>
    %102 = math.exp %101 : vector<2x8x8xf32>
    %cst_30 = arith.constant dense<0.000000e+00> : vector<2x8xf32>
    %103 = vector.multi_reduction <add>, %102, %cst_30 [2] : vector<2x8x8xf32> to vector<2x8xf32>
    %104 = vector.shape_cast %103 : vector<2x8xf32> to vector<2x8x1xf32>
    %105 = tpu.reciprocal %104 {approx = true} : vector<2x8x1xf32> -> vector<2x8x1xf32>
    %106 = vector.broadcast %105 : vector<2x8x1xf32> to vector<2x8x8xf32>
    %107 = arith.mulf %102, %106 : vector<2x8x8xf32>
    "tpu.trace_start"() <{level = 10 : i32, message = "blm,bmd->bld"}> : () -> ()
    %cst_31 = arith.constant dense<0.000000e+00> : vector<2x8x8xf32>
    %108 = tpu.matmul %107, %94, %cst_31 {dimension_numbers = #tpu.dot_dimension_numbers<[2], [1], [1], [2], [0, 0, 0, 1, 1, 2], [0], [0]>} : vector<2x8x8xf32>, vector<2x8x8xf32>, vector<2x8x8xf32> -> vector<2x8x8xf32>
    "tpu.trace_stop"() : () -> ()
    %109 = tpu.concatenate %57, %74, %91, %108 in 2 : vector<2x8x8xf32>, vector<2x8x8xf32>, vector<2x8x8xf32>, vector<2x8x8xf32> -> vector<2x8x32xf32>
    %110 = vector.shape_cast %109 : vector<2x8x32xf32> to vector<16x32xf32>
    %c0_32 = arith.constant 0 : index
    %c0_33 = arith.constant 0 : index
    %111 = vector.load %arg2[%c0_32, %c0_33] : memref<32x32xf32, #tpu.memory_space<vmem>>, vector<32x32xf32>
    %cst_34 = arith.constant dense<0.000000e+00> : vector<16x32xf32>
    %112 = tpu.matmul %110, %111, %cst_34 {dimension_numbers = #tpu.dot_dimension_numbers<[1], [0], [0], [1], [0, 0, 1, 1], [], []>} : vector<16x32xf32>, vector<32x32xf32>, vector<16x32xf32> -> vector<16x32xf32>
    %113 = arith.addf %1, %112 : vector<16x32xf32>
    %c0_35 = arith.constant 0 : index
    %c0_36 = arith.constant 0 : index
    %114 = vector.load %arg9[%c0_35, %c0_36] : memref<1x32xf32, #tpu.memory_space<vmem>>, vector<1x32xf32>
    %c0_37 = arith.constant 0 : index
    %c0_38 = arith.constant 0 : index
    %115 = vector.load %arg10[%c0_37, %c0_38] : memref<1x32xf32, #tpu.memory_space<vmem>>, vector<1x32xf32>
    %cst_39 = arith.constant dense<0.000000e+00> : vector<16xf32>
    %116 = vector.multi_reduction <add>, %113, %cst_39 [1] : vector<16x32xf32> to vector<16xf32>
    %117 = vector.shape_cast %116 : vector<16xf32> to vector<16x1xf32>
    %cst_40 = arith.constant 3.200000e+01 : f32
    %118 = vector.broadcast %cst_40 : f32 to vector<16x1xf32>
    %119 = arith.divf %117, %118 : vector<16x1xf32>
    %120 = vector.broadcast %119 : vector<16x1xf32> to vector<16x32xf32>
    %121 = arith.subf %113, %120 : vector<16x32xf32>
    %122 = arith.mulf %121, %121 : vector<16x32xf32>
    %cst_41 = arith.constant dense<0.000000e+00> : vector<16xf32>
    %123 = vector.multi_reduction <add>, %122, %cst_41 [1] : vector<16x32xf32> to vector<16xf32>
    %124 = vector.shape_cast %123 : vector<16xf32> to vector<16x1xf32>
    %cst_42 = arith.constant 3.200000e+01 : f32
    %125 = vector.broadcast %cst_42 : f32 to vector<16x1xf32>
    %126 = arith.divf %124, %125 : vector<16x1xf32>
    %127 = vector.broadcast %119 : vector<16x1xf32> to vector<16x32xf32>
    %128 = arith.subf %113, %127 : vector<16x32xf32>
    %cst_43 = arith.constant 9.99999974E-6 : f32
    %129 = vector.broadcast %cst_43 : f32 to vector<16x1xf32>
    %130 = arith.addf %126, %129 : vector<16x1xf32>
    %131 = math.rsqrt %130 : vector<16x1xf32>
    %132 = vector.broadcast %131 : vector<16x1xf32> to vector<16x32xf32>
    %133 = arith.mulf %128, %132 : vector<16x32xf32>
    %134 = vector.broadcast %114 : vector<1x32xf32> to vector<16x32xf32>
    %135 = arith.mulf %133, %134 : vector<16x32xf32>
    %136 = vector.broadcast %115 : vector<1x32xf32> to vector<16x32xf32>
    %137 = arith.addf %135, %136 : vector<16x32xf32>
    %c0_44 = arith.constant 0 : index
    %c0_45 = arith.constant 0 : index
    %138 = vector.load %arg3[%c0_44, %c0_45] : memref<32x64xf32, #tpu.memory_space<vmem>>, vector<32x64xf32>
    %cst_46 = arith.constant dense<0.000000e+00> : vector<16x64xf32>
    %139 = tpu.matmul %137, %138, %cst_46 {dimension_numbers = #tpu.dot_dimension_numbers<[1], [0], [0], [1], [0, 0, 1, 1], [], []>} : vector<16x32xf32>, vector<32x64xf32>, vector<16x64xf32> -> vector<16x64xf32>
    %c0_47 = arith.constant 0 : index
    %c0_48 = arith.constant 0 : index
    %140 = vector.load %arg4[%c0_47, %c0_48] : memref<1x64xf32, #tpu.memory_space<vmem>>, vector<1x64xf32>
    %141 = vector.broadcast %140 : vector<1x64xf32> to vector<16x64xf32>
    %142 = arith.addf %139, %141 : vector<16x64xf32>
    %cst_49 = arith.constant 0.000000e+00 : f32
    %143 = vector.broadcast %cst_49 : f32 to vector<16x64xf32>
    %144 = arith.maximumf %142, %143 : vector<16x64xf32>
    %c0_50 = arith.constant 0 : index
    %c0_51 = arith.constant 0 : index
    %145 = vector.load %arg5[%c0_50, %c0_51] : memref<64x32xf32, #tpu.memory_space<vmem>>, vector<64x32xf32>
    %cst_52 = arith.constant dense<0.000000e+00> : vector<16x32xf32>
    %146 = tpu.matmul %144, %145, %cst_52 {dimension_numbers = #tpu.dot_dimension_numbers<[1], [0], [0], [1], [0, 0, 1, 1], [], []>} : vector<16x64xf32>, vector<64x32xf32>, vector<16x32xf32> -> vector<16x32xf32>
    %c0_53 = arith.constant 0 : index
    %c0_54 = arith.constant 0 : index
    %147 = vector.load %arg6[%c0_53, %c0_54] : memref<1x32xf32, #tpu.memory_space<vmem>>, vector<1x32xf32>
    %148 = vector.broadcast %147 : vector<1x32xf32> to vector<16x32xf32>
    %149 = arith.addf %146, %148 : vector<16x32xf32>
    %150 = arith.addf %113, %149 : vector<16x32xf32>
    %151 = vector.shape_cast %150 : vector<16x32xf32> to vector<2x8x32xf32>
    %c0_55 = arith.constant 0 : index
    %c0_56 = arith.constant 0 : index
    %c0_57 = arith.constant 0 : index
    %152 = vector.load %arg11[%c0_55, %c0_56, %c0_57] : memref<2x8x32xf32, #tpu.memory_space<vmem>>, vector<2x8x32xf32>
    tpu.vector_store %arg11[%c0_55, %c0_56, %c0_57], %151 {strides = array<i32>} : memref<2x8x32xf32, #tpu.memory_space<vmem>>, vector<2x8x32xf32>,
    return
  }
}

</mosaic_0001>

<bundles_post_ra>
// kernel: tpu_custom_call.1
= control target key start
LH: loop header
LB: loop body
LE: loop exit
PB: predicated region body
PF: predicated region fallthrough
CT: control target
= control target key end

     0   :  { %16 = vsyncpa [#allocation3], 0  ;;  %s2640_s0 = inlined_call_operand.hbm [shape: f32[2,8,32], index: 0, kind: input, shape index: {}]   ;;  %s2641_s1 = inlined_call_operand.vmem [shape: f32[32,96], index: 1, kind: input, shape index: {}]   ;;  %s2642_s2 = inlined_call_operand.vmem [shape: f32[32,32], index: 2, kind: input, shape index: {}]   ;;  %s2643_s3 = inlined_call_operand.vmem [shape: f32[32,64], index: 3, kind: input, shape index: {}]   ;;  %s2644_s4 = inlined_call_operand.vmem [shape: f32[1,64], index: 4, kind: input, shape index: {}]   ;;  %s2645_s5 = inlined_call_operand.vmem [shape: f32[64,32], index: 5, kind: input, shape index: {}]   ;;  %s2646_s6 = inlined_call_operand.vmem [shape: f32[1,32], index: 6, kind: input, shape index: {}]   ;;  %s2647_s7 = inlined_call_operand.vmem [shape: f32[1,32], index: 7, kind: input, shape index: {}]   ;;  %s2648_s8 = inlined_call_operand.vmem [shape: f32[1,32], index: 8, kind: input, shape index: {}]   ;;  %s2649_s9 = inlined_call_operand.vmem [shape: f32[1,32], index: 9, kind: input, shape index: {}]   ;;  %s2650_s10 = inlined_call_operand.vmem [shape: f32[1,32], index: 10, kind: input, shape index: {}]   ;;  %s2651_s11 = inlined_call_operand.hbm [shape: f32[2,8,32], index: 11, kind: output, shape index: {}]  }
   0x1   :  { %17 = vsyncpa [#allocation4], 0  ;;  %s2268_s17 = smov [#allocation2]   ;;  %s2220_s21 = scalar_lea.hbm %s2640_s0, 256 }
   0x2   :  { %s23_s18 = sshll.u32 %s2268_s17, 4  ;;  %p2221_p0 = scmp.ne.s32.totalorder %s2640_s0, %s2220_s21  ;;  %s24_s18 = int_to_ptr.vmem [resolvable:$true] %s23_s18 }
   0x3   :  { %p2224_p1 = scmp.lt.u32.totalorder %s2220_s21, %s2640_s0 }
   0x5   :  { %p2226_p2 = pnand %p2224_p1, %p2221_p0 }
   0x7   :  { %2229 = shalt.err (!%p2226_p2)
}
   0x8   :  { %s2230_s26 = scalar_lea.vmem %s24_s18, 256  ;;  %p2235_p4 = scmp.lt.s32.totalorder %s24_s18, %s24_s18 }
   0x9   :  { %p2231_p3 = scmp.ne.s32.totalorder %s24_s18, %s2230_s26  ;;  %p2236_p5 = scmp.lt.s32.totalorder %s2230_s26, %s2230_s26 }
   0xb   :  { %p2237_p6 = por %p2236_p5, %p2235_p4 }
   0xd   :  { %p2238_p7 = pnand %p2237_p6, %p2231_p3 }
   0xf   :  { %2241 = shalt.err (!%p2238_p7)
}
  0x10   :  { %s2269_s27 = smov 128   ;;  %s2270_s28 = smov 8  }
  0x11   :  { %29 = dma.hbm_to_vmem [thread:$0]  %s2640_s0, 256, %s24_s18, [#allocation3], %s2269_s27, %s2269_s27, %s2270_s28  }
  0x12   :  { %2264 = dma.done.wait [#allocation3], 256  }
  0x13   :  { %2265 = vsyncadd [#allocation3], 4294967040  ;;  %vm57_vm0 = vcmask 261120   ;;  %v2363_v0 = vld [vmem:[#allocation2] sm:$0xff]  ;;  %v2365_v1 = vld [vmem:[#allocation2 + $0x8] sm:$0xff]  ;;  %v2271_v36 = vmov 0.0   ;;  %v188_v43 = vlaneseq }
  0x14   :  { %v58_v2 = vsel %vm57_vm0, %v2363_v0, 0.0  ;;  %v61_v3 = vsel %vm57_vm0, %v2365_v1, 0.0  ;;  %v101_v14 = vld [vmem:[%s2641_s1] sm:$0xff]  ;;  %v102_v15 = vld [vmem:[%s2641_s1 + $0x8] sm:$0xff]  ;;  %v103_v16 = vld [vmem:[%s2641_s1 + $0x10] sm:$0xff]  ;;  %2009 = vmatprep.subr.mxu0 %v2271_v36  ;;  %vm2272_vm1 = vmmov 0  }
  0x15   :  { %59 = vadd.xlane.f32.xlu0 %v58_v2  ;;  %v2120_v17 = vpack.c.bf16 %v102_v15, %v101_v14  ;;  %v104_v18 = vld [vmem:[%s2641_s1 + $0x18] sm:$0xff]  ;;  %v1890_v27 = vld [vmem:[%s2647_s7] ss:$0 sm:$0xff]  ;;  %2011 = vmatprep.mubr.msk.f32.mxu0 %vm2272_vm1, %v2271_v36  ;;  %s2273_s7 = smov 96   ;;  %vm197_vm2 = vcmask 64512   ;;  %v189_v44 = vshrl.u32 %v188_v43, 7 }
  0x16   :  { %v2124_v19 = vpack.c.bf16 %v104_v18, %v103_v16  ;;  %v1891_v29 = vld [vmem:[%s2648_s8] ss:$0 sm:$0xff]  ;;  %v191_v45 = vand.u32 127, %v188_v43  ;;  %v2274_v46 = vmov -1e+30   ;;  %s2275_s8 = smov 64  }
  0x17   :  { %2121 = vmatprep.subr.bf16.mxu1 %v2120_v17  ;;  %s2276_s22 = smov 88   ;;  %s2277_s23 = smov 120   ;;  %vm1544_vm4 = vcmask 195584   ;;  %vm1541_vm5 = vcmask 130048   ;;  %vm1787_vm6 = vcmask 523264  }
  0x18   :  { %2123 = vmatpush3.bf16.msra.mxu1 %v2120_v17  ;;  %vm192_vm3 = vcmp.le.s32.totalorder %v191_v45, %v189_v44  ;;  %s2278_s24 = smov 56   ;;  %s2279_s25 = smov 80  }
  0x19   :  { %62 = vadd.xlane.f32.xlu0 %v61_v3  ;;  %2125 = vmatprep.subr.bf16.mxu1 %v2124_v19  ;;  %v2425_v47 = vsel %vm192_vm3, 0.0, %v2274_v46  ;;  %s2280_s26 = smov 112   ;;  %s2281_s29 = smov 48  }
  0x1a   :  { %s2282_s30 = smov 72   ;;  %s2283_s0 = smov 104  }
  0x1b   :  { %s2284_s12 = smov 40   ;;  %s2285_s13 = smov 16  }
  0x1c   :  { %2127 = vmatpush3.bf16.msra.mxu1 %v2124_v19  ;;  %s2286_s21 = smov 24  }
  0x1d   :  { %1999 = vmatprep.subr.mxu1 %v2271_v36 }
  0xa2   :  { %v60_v4 = vpop.xlane.xlu0 %59 }
  0xa3   :  { %v65_v5 = vmul.f32 0.03125, %v60_v4 }
  0xa5   :  { %v67_v6 = vsub.f32 %v2363_v0, %v65_v5 }
  0xa6   :  { %v63_v7 = vpop.xlane.xlu0 %62 }
  0xa7   :  { %v66_v8 = vmul.f32 0.03125, %v63_v7  ;;  %v69_v9 = vmul.f32 %v67_v6, %v67_v6 }
  0xa9   :  { %v68_v10 = vsub.f32 %v2365_v1, %v66_v8  ;;  %v71_v11 = vsel %vm57_vm0, %v69_v9, 0.0 }
  0xaa   :  { %72 = vadd.xlane.f32.xlu1 %v71_v11 }
  0xab   :  { %v70_v12 = vmul.f32 %v68_v10, %v68_v10 }
  0xad   :  { %v74_v13 = vsel %vm57_vm0, %v70_v12, 0.0 }
  0xae   :  { %75 = vadd.xlane.f32.xlu1 %v74_v13 }
 0x137   :  { %v73_v20 = vpop.xlane.xlu1 %72 }
 0x138   :  { %v77_v21 = vmul.f32 0.03125, %v73_v20 }
 0x13a   :  { %v79_v22 = vadd.f32 1e-05, %v77_v21 }
 0x13b   :  { %v76_v23 = vpop.xlane.xlu1 %75 }
 0x13c   :  { %2180 = vrsqrt.f32 %v79_v22  ;;  %v78_v24 = vmul.f32 0.03125, %v76_v23 }
 0x13e   :  { %v80_v25 = vadd.f32 1e-05, %v78_v24 }
 0x140   :  { %2182 = vrsqrt.f32 %v80_v25 }
 0x146   :  { %v2181_v26 = vpop.eup %2180 }
 0x147   :  { %v83_v28 = vmul.f32 %v2181_v26, %v67_v6 }
 0x149   :  { %v91_v30 = vmul.f32 %v1890_v27, %v83_v28 }
 0x14a   :  { %v2183_v31 = vpop.eup %2182 }
 0x14b   :  { %v84_v32 = vmul.f32 %v2183_v31, %v68_v10  ;;  %v99_v33 = vadd.f32 %v1891_v29, %v91_v30 }
 0x14d   :  { %v92_v34 = vmul.f32 %v1890_v27, %v84_v32  ;;  %1996 = vmatprep.mubr.msk.f32.mxu1 %vm57_vm0, %v99_v33 }
 0x14f   :  { %v100_v35 = vadd.f32 %v1891_v29, %v92_v34 }
 0x151   :  { %1997 = vmatmul.mubr.msk.f32.vlgmr.msra.gmra.mrb[0].mxu1 %vm57_vm0, %v100_v35 }
 0x152   :  { %2001 = vmatprep.mubr.msk.f32.mxu1 %vm2272_vm1, %v2271_v36 }
 0x224   :  { %v2401_v37 = vpop.f32.mrb[0].mxu1 }
 0x225   :  { %274 = vrot.lane.b32.xlu1 %v2401_v37, %s2273_s7  ;;  %v2404_v38 = vpop.f32.mrb[1].mxu1  ;;  %v2418_v42 = vmul.f32 0.35355338, %v2401_v37 }
 0x226   :  { %195 = vrot.lane.b32.xlu0 %v2404_v38, %s2273_s7  ;;  %v2409_v40 = vmul.f32 0.35355338, %v2404_v38 }
 0x297   :  { %v275_v41 = vpop.permute.xlu1 %274 }
 0x298   :  { %v196_v39 = vpop.permute.xlu0 %195 }
 0x299   :  { %2000 = vmatpush3.xpose.msk.msra.mxu1 %vm197_vm2, %v196_v39 }
 0x29a   :  { %2004 = vmatprep.subr.mxu1 %v2271_v36 }
 0x29c   :  { %2002 = vmatmul.mubr.msk.f32.vlgmr.msra.gmra.mrb[2].mxu1 %vm197_vm2, %v2409_v40 }
 0x29d   :  { %2005 = vmatpush3.xpose.msk.msra.mxu1 %vm197_vm2, %v275_v41  ;;  %2006 = vmatprep.mubr.msk.f32.mxu1 %vm2272_vm1, %v2271_v36 }
 0x29e   :  { %2014 = vmatprep.subr.mxu1 %v2271_v36 }
 0x2a0   :  { %2007 = vmatmul.mubr.msk.f32.vlgmr.msra.gmra.mrb[4].mxu1 %vm197_vm2, %v2418_v42 }
 0x2a1   :  { %2016 = vmatprep.mubr.msk.f32.mxu1 %vm2272_vm1, %v2271_v36 }
 0x36f   :  { %v269_v48 = vpop.f32.mrb[2].mxu1 }
 0x370   :  { %v270_v49 = vadd.f32 %v269_v48, %v2425_v47  ;;  %v2003_v50 = vpop.f32.mrb[3].mxu1 }
 0x372   :  { %v351_v51 = vsel %vm197_vm2, %v270_v49, -inf }
 0x373   :  { %352 = vmax.xlane.f32.xlu1 %v351_v51  ;;  %v347_v52 = vpop.f32.mrb[4].mxu1 }
 0x374   :  { %v348_v53 = vadd.f32 %v347_v52, %v2425_v47  ;;  %v2008_v54 = vpop.f32.mrb[5].mxu1 }
 0x376   :  { %v354_v55 = vsel %vm197_vm2, %v348_v53, -inf }
 0x377   :  { %355 = vmax.xlane.f32.xlu0 %v354_v55 }
 0x384   :  { %449 = vrot.lane.b32.xlu1 %v2401_v37, %s2275_s8 }
 0x388   :  { %527 = vrot.lane.b32.xlu1 %v2404_v38, %s2276_s22 }
 0x38c   :  { %605 = vrot.lane.b32.xlu1 %v2401_v37, %s2276_s22 }
 0x38d   :  { %373 = vrot.lane.b32.xlu0 %v2404_v38, %s2275_s8 }
 0x400   :  { %v353_v56 = vpop.xlane.xlu1 %352 }
 0x401   :  { %v357_v57 = vsub.f32 %v270_v49, %v353_v56 }
 0x403   :  { %v359_v58 = vmul.f32 1.442695, %v357_v57 }
 0x404   :  { %v450_v59 = vpop.permute.xlu1 %449  ;;  %v356_v60 = vpop.xlane.xlu0 %355 }
 0x405   :  { %2184 = vpow2.f32 %v359_v58  ;;  %v358_v61 = vsub.f32 %v348_v53, %v356_v60  ;;  %2015 = vmatpush3.msra.mxu1 %v450_v59 }
 0x406   :  { %2024 = vmatprep.subr.mxu1 %v2271_v36 }
 0x407   :  { %v361_v62 = vmul.f32 1.442695, %v358_v61 }
 0x408   :  { %v374_v63 = vpop.permute.xlu0 %373  ;;  %v528_v6 = vpop.permute.xlu1 %527 }
 0x409   :  { %2186 = vpow2.f32 %v361_v62  ;;  %2010 = vmatpush3.msra.mxu0 %v374_v63 }
 0x40a   :  { %2019 = vmatprep.subr.mxu0 %v2271_v36 }
 0x40c   :  { %v606_v7 = vpop.permute.xlu1 %605 }
 0x40f   :  { %v2185_v2 = vpop.eup %2184 }
 0x410   :  { %v363_v3 = vsel %vm197_vm2, %v2185_v2, 0.0 }
 0x411   :  { %364 = vadd.xlane.f32.xlu0 %v363_v3 }
 0x413   :  { %v2187_v4 = vpop.eup %2186 }
 0x414   :  { %v366_v5 = vsel %vm197_vm2, %v2187_v4, 0.0 }
 0x415   :  { %367 = vadd.xlane.f32.xlu1 %v366_v5 }
 0x426   :  { %603 = vrot.lane.b32.xlu1 %v2418_v42, %s2277_s23 }
 0x427   :  { %525 = vrot.lane.b32.xlu0 %v2409_v40, %s2277_s23 }
 0x49e   :  { %v365_v8 = vpop.xlane.xlu0 %364 }
 0x49f   :  { %2188 = vrcp.f32 %v365_v8 }
 0x4a2   :  { %v368_v9 = vpop.xlane.xlu1 %367  ;;  %v526_v14 = vpop.permute.xlu0 %525 }
 0x4a3   :  { %2190 = vrcp.f32 %v368_v9 }
 0x4a6   :  { %v604_v15 = vpop.permute.xlu1 %603 }
 0x4a9   :  { %v2189_v10 = vpop.eup %2188 }
 0x4aa   :  { %v371_v11 = vmul.f32 %v2189_v10, %v2185_v2 }
 0x4ac   :  { %2012 = vmatmul.mubr.msk.f32.vlgmr.msra.gmra.mrb[0].mxu0 %vm197_vm2, %v371_v11 }
 0x4ad   :  { %v2191_v12 = vpop.eup %2190  ;;  %2020 = vmatpush3.xpose.msk.msra.mxu0 %vm197_vm2, %v528_v6  ;;  %2021 = vmatprep.mubr.msk.f32.mxu0 %vm2272_vm1, %v2271_v36 }
 0x4ae   :  { %v372_v13 = vmul.f32 %v2191_v12, %v2187_v4  ;;  %2029 = vmatprep.subr.mxu0 %v2271_v36 }
 0x4b0   :  { %2017 = vmatmul.mubr.msk.f32.vlgmr.msra.gmra.mrb[6].mxu1 %vm197_vm2, %v372_v13  ;;  %2022 = vmatmul.mubr.msk.f32.vlgmr.msra.gmra.mrb[2].mxu0 %vm197_vm2, %v526_v14 }
 0x4b1   :  { %2025 = vmatpush3.xpose.msk.msra.mxu1 %vm197_vm2, %v606_v7  ;;  %2026 = vmatprep.mubr.msk.f32.mxu1 %vm2272_vm1, %v2271_v36 }
 0x4b2   :  { %2034 = vmatprep.subr.mxu1 %v2271_v36  ;;  %2031 = vmatprep.mubr.msk.f32.mxu0 %vm2272_vm1, %v2271_v36 }
 0x4b4   :  { %2027 = vmatmul.mubr.msk.f32.vlgmr.msra.gmra.mrb[8].mxu1 %vm197_vm2, %v604_v15 }
 0x4b5   :  { %2036 = vmatprep.mubr.msk.f32.mxu1 %vm2272_vm1, %v2271_v36 }
 0x57f   :  { %v2457_v16 = vpop.f32.mrb[0].mxu0 }
 0x580   :  { %v2013_v17 = vpop.f32.mrb[1].mxu0 }
 0x583   :  { %v2459_v18 = vpop.f32.mrb[6].mxu1  ;;  %v599_v19 = vpop.f32.mrb[2].mxu0 }
 0x584   :  { %v600_v20 = vadd.f32 %v599_v19, %v2425_v47  ;;  %v2018_v21 = vpop.f32.mrb[7].mxu1  ;;  %v2023_v22 = vpop.f32.mrb[3].mxu0 }
 0x586   :  { %v681_v23 = vsel %vm197_vm2, %v600_v20, -inf }
 0x587   :  { %682 = vmax.xlane.f32.xlu0 %v681_v23  ;;  %v677_v24 = vpop.f32.mrb[8].mxu1 }
 0x588   :  { %v678_v25 = vadd.f32 %v677_v24, %v2425_v47  ;;  %v2028_v26 = vpop.f32.mrb[9].mxu1 }
 0x58a   :  { %v684_v27 = vsel %vm197_vm2, %v678_v25, -inf }
 0x58b   :  { %685 = vmax.xlane.f32.xlu1 %v684_v27 }
 0x59c   :  { %779 = vrot.lane.b32.xlu1 %v2401_v37, %s2278_s24 }
 0x59d   :  { %703 = vrot.lane.b32.xlu0 %v2404_v38, %s2278_s24 }
 0x5a0   :  { %857 = vrot.lane.b32.xlu1 %v2404_v38, %s2279_s25 }
 0x5a4   :  { %935 = vrot.lane.b32.xlu1 %v2401_v37, %s2279_s25 }
 0x5a8   :  { %933 = vrot.lane.b32.xlu1 %v2418_v42, %s2280_s26 }
 0x614   :  { %v683_v28 = vpop.xlane.xlu0 %682 }
 0x615   :  { %v687_v29 = vsub.f32 %v600_v20, %v683_v28 }
 0x617   :  { %v689_v30 = vmul.f32 1.442695, %v687_v29 }
 0x618   :  { %v704_v31 = vpop.permute.xlu0 %703  ;;  %v686_v32 = vpop.xlane.xlu1 %685 }
 0x619   :  { %2192 = vpow2.f32 %v689_v30  ;;  %v688_v33 = vsub.f32 %v678_v25, %v686_v32  ;;  %2030 = vmatpush3.msra.mxu0 %v704_v31 }
 0x61a   :  { %2039 = vmatprep.subr.mxu0 %v2271_v36 }
 0x61b   :  { %v691_v34 = vmul.f32 1.442695, %v688_v33 }
 0x61c   :  { %v780_v35 = vpop.permute.xlu1 %779 }
 0x61d   :  { %2194 = vpow2.f32 %v691_v34  ;;  %2035 = vmatpush3.msra.mxu1 %v780_v35 }
 0x61e   :  { %2044 = vmatprep.subr.mxu1 %v2271_v36 }
 0x620   :  { %v858_v48 = vpop.permute.xlu1 %857 }
 0x623   :  { %v2193_v39 = vpop.eup %2192 }
 0x624   :  { %v693_v41 = vsel %vm197_vm2, %v2193_v39, 0.0  ;;  %v936_v52 = vpop.permute.xlu1 %935 }
 0x625   :  { %694 = vadd.xlane.f32.xlu0 %v693_v41 }
 0x627   :  { %v2195_v43 = vpop.eup %2194 }
 0x628   :  { %v696_v44 = vsel %vm197_vm2, %v2195_v43, 0.0  ;;  %v934_v55 = vpop.permute.xlu1 %933 }
 0x629   :  { %697 = vadd.xlane.f32.xlu0 %v696_v44 }
 0x63f   :  { %855 = vrot.lane.b32.xlu0 %v2409_v40, %s2280_s26 }
 0x6b2   :  { %v695_v45 = vpop.xlane.xlu0 %694 }
 0x6b3   :  { %2196 = vrcp.f32 %v695_v45 }
 0x6b6   :  { %v698_v46 = vpop.xlane.xlu0 %697 }
 0x6b7   :  { %2198 = vrcp.f32 %v698_v46 }
 0x6ba   :  { %v856_v54 = vpop.permute.xlu0 %855 }
 0x6bd   :  { %v2197_v49 = vpop.eup %2196 }
 0x6be   :  { %v701_v50 = vmul.f32 %v2197_v49, %v2193_v39 }
 0x6c0   :  { %2032 = vmatmul.mubr.msk.f32.vlgmr.msra.gmra.mrb[4].mxu0 %vm197_vm2, %v701_v50 }
 0x6c1   :  { %v2199_v51 = vpop.eup %2198  ;;  %2040 = vmatpush3.xpose.msk.msra.mxu0 %vm197_vm2, %v858_v48  ;;  %2041 = vmatprep.mubr.msk.f32.mxu0 %vm2272_vm1, %v2271_v36 }
 0x6c2   :  { %v702_v53 = vmul.f32 %v2199_v51, %v2195_v43  ;;  %2049 = vmatprep.subr.mxu0 %v2271_v36 }
 0x6c4   :  { %2037 = vmatmul.mubr.msk.f32.vlgmr.msra.gmra.mrb[10].mxu1 %vm197_vm2, %v702_v53  ;;  %2042 = vmatmul.mubr.msk.f32.vlgmr.msra.gmra.mrb[6].mxu0 %vm197_vm2, %v856_v54 }
 0x6c5   :  { %2045 = vmatpush3.xpose.msk.msra.mxu1 %vm197_vm2, %v936_v52  ;;  %2046 = vmatprep.mubr.msk.f32.mxu1 %vm2272_vm1, %v2271_v36 }
 0x6c6   :  { %2054 = vmatprep.subr.mxu1 %v2271_v36  ;;  %2051 = vmatprep.mubr.msk.f32.mxu0 %vm2272_vm1, %v2271_v36 }
 0x6c8   :  { %2047 = vmatmul.mubr.msk.f32.vlgmr.msra.gmra.mrb[12].mxu1 %vm197_vm2, %v934_v55 }
 0x6c9   :  { %2056 = vmatprep.mubr.msk.f32.mxu1 %vm2272_vm1, %v2271_v36 }
 0x793   :  { %v2491_v56 = vpop.f32.mrb[4].mxu0 }
 0x794   :  { %v2033_v57 = vpop.f32.mrb[5].mxu0 }
 0x797   :  { %v2493_v58 = vpop.f32.mrb[10].mxu1  ;;  %v929_v59 = vpop.f32.mrb[6].mxu0 }
 0x798   :  { %v930_v60 = vadd.f32 %v929_v59, %v2425_v47  ;;  %v2038_v61 = vpop.f32.mrb[11].mxu1  ;;  %v2043_v62 = vpop.f32.mrb[7].mxu0 }
 0x799   :  { %v1547_v61 = vld [vmem:[%s2642_s2] sm:$0xff] }
 0x79a   :  { %v1011_v63 = vsel %vm197_vm2, %v930_v60, -inf }
 0x79b   :  { %1012 = vmax.xlane.f32.xlu0 %v1011_v63  ;;  %v1007_v2 = vpop.f32.mrb[12].mxu1  ;;  %v1549_v63 = vld [vmem:[%s2642_s2 + $0x10] sm:$0xff] }
 0x79c   :  { %v1008_v3 = vadd.f32 %v1007_v2, %v2425_v47  ;;  %v2048_v4 = vpop.f32.mrb[13].mxu1  ;;  %v1550_v2 = vld [vmem:[%s2642_s2 + $0x18] sm:$0xff] }
 0x79e   :  { %v1014_v5 = vsel %vm197_vm2, %v1008_v3, -inf }
 0x79f   :  { %1015 = vmax.xlane.f32.xlu1 %v1014_v5 }
 0x7b0   :  { %1109 = vrot.lane.b32.xlu1 %v2401_v37, %s2281_s29 }
 0x7b1   :  { %1033 = vrot.lane.b32.xlu0 %v2404_v38, %s2281_s29 }
 0x7b4   :  { %1187 = vrot.lane.b32.xlu1 %v2404_v38, %s2282_s30 }
 0x7b8   :  { %1265 = vrot.lane.b32.xlu1 %v2401_v37, %s2282_s30 }
 0x7bc   :  { %1263 = vrot.lane.b32.xlu1 %v2418_v42, %s2283_s0 }
 0x828   :  { %v1013_v6 = vpop.xlane.xlu0 %1012 }
 0x829   :  { %v1017_v7 = vsub.f32 %v930_v60, %v1013_v6 }
 0x82b   :  { %v1019_v8 = vmul.f32 1.442695, %v1017_v7 }
 0x82c   :  { %v1034_v9 = vpop.permute.xlu0 %1033  ;;  %v1016_v10 = vpop.xlane.xlu1 %1015 }
 0x82d   :  { %2200 = vpow2.f32 %v1019_v8  ;;  %v1018_v11 = vsub.f32 %v1008_v3, %v1016_v10  ;;  %2050 = vmatpush3.msra.mxu0 %v1034_v9  ;;  %v2132_v3 = vpack.c.bf16 %v1550_v2, %v1549_v63 }
 0x82e   :  { %2059 = vmatprep.subr.mxu0 %v2271_v36 }
 0x82f   :  { %v1021_v12 = vmul.f32 1.442695, %v1018_v11 }
 0x830   :  { %v1110_v13 = vpop.permute.xlu1 %1109 }
 0x831   :  { %2202 = vpow2.f32 %v1021_v12  ;;  %2055 = vmatpush3.msra.mxu1 %v1110_v13 }
 0x832   :  { %2064 = vmatprep.subr.mxu1 %v2271_v36 }
 0x834   :  { %v1188_v21 = vpop.permute.xlu1 %1187 }
 0x837   :  { %v2201_v14 = vpop.eup %2200 }
 0x838   :  { %v1023_v15 = vsel %vm197_vm2, %v2201_v14, 0.0  ;;  %v1266_v25 = vpop.permute.xlu1 %1265 }
 0x839   :  { %1024 = vadd.xlane.f32.xlu0 %v1023_v15 }
 0x83b   :  { %v2203_v42 = vpop.eup %2202 }
 0x83c   :  { %v1026_v17 = vsel %vm197_vm2, %v2203_v42, 0.0  ;;  %v1264_v27 = vpop.permute.xlu1 %1263 }
 0x83d   :  { %1027 = vadd.xlane.f32.xlu0 %v1026_v17 }
 0x853   :  { %1185 = vrot.lane.b32.xlu0 %v2409_v40, %s2283_s0 }
 0x8c6   :  { %v1025_v19 = vpop.xlane.xlu0 %1024 }
 0x8c7   :  { %2204 = vrcp.f32 %v1025_v19 }
 0x8ca   :  { %v1028_v20 = vpop.xlane.xlu0 %1027 }
 0x8cb   :  { %2206 = vrcp.f32 %v1028_v20 }
 0x8ce   :  { %v1186_v40 = vpop.permute.xlu0 %1185 }
 0x8d1   :  { %v2205_v22 = vpop.eup %2204 }
 0x8d2   :  { %v1031_v23 = vmul.f32 %v2205_v22, %v2201_v14 }
 0x8d4   :  { %2052 = vmatmul.mubr.msk.f32.vlgmr.msra.gmra.mrb[8].mxu0 %vm197_vm2, %v1031_v23 }
 0x8d5   :  { %v2207_v24 = vpop.eup %2206  ;;  %2060 = vmatpush3.xpose.msk.msra.mxu0 %vm197_vm2, %v1188_v21  ;;  %2061 = vmatprep.mubr.msk.f32.mxu0 %vm2272_vm1, %v2271_v36 }
 0x8d6   :  { %v1032_v26 = vmul.f32 %v2207_v24, %v2203_v42  ;;  %2069 = vmatprep.subr.mxu0 %v2271_v36 }
 0x8d8   :  { %2057 = vmatmul.mubr.msk.f32.vlgmr.msra.gmra.mrb[14].mxu1 %vm197_vm2, %v1032_v26  ;;  %2062 = vmatmul.mubr.msk.f32.vlgmr.msra.gmra.mrb[10].mxu0 %vm197_vm2, %v1186_v40 }
 0x8d9   :  { %2065 = vmatpush3.xpose.msk.msra.mxu1 %vm197_vm2, %v1266_v25  ;;  %2066 = vmatprep.mubr.msk.f32.mxu1 %vm2272_vm1, %v2271_v36 }
 0x8da   :  { %2074 = vmatprep.subr.mxu1 %v2271_v36  ;;  %2071 = vmatprep.mubr.msk.f32.mxu0 %vm2272_vm1, %v2271_v36 }
 0x8dc   :  { %2067 = vmatmul.mubr.msk.f32.vlgmr.msra.gmra.mrb[16].mxu1 %vm197_vm2, %v1264_v27 }
 0x8dd   :  { %2076 = vmatprep.mubr.msk.f32.mxu1 %vm2272_vm1, %v2271_v36 }
 0x9a7   :  { %v1105_v28 = vpop.f32.mrb[8].mxu0 }
 0x9a8   :  { %v2053_v29 = vpop.f32.mrb[9].mxu0 }
 0x9ab   :  { %v1181_v30 = vpop.f32.mrb[14].mxu1  ;;  %v1259_v31 = vpop.f32.mrb[10].mxu0 }
 0x9ac   :  { %v1260_v32 = vadd.f32 %v1259_v31, %v2425_v47  ;;  %v2058_v33 = vpop.f32.mrb[15].mxu1  ;;  %v2063_v34 = vpop.f32.mrb[11].mxu0 }
 0x9ad   :  { %v1679_v33 = vld [vmem:[%s2643_s3 + $0x8] sm:$0xff] }
 0x9ae   :  { %v1341_v35 = vsel %vm197_vm2, %v1260_v32, -inf }
 0x9af   :  { %1342 = vmax.xlane.f32.xlu0 %v1341_v35  ;;  %v1337_v39 = vpop.f32.mrb[16].mxu1  ;;  %v1680_v35 = vld [vmem:[%s2643_s3 + $0x10] sm:$0xff] }
 0x9b0   :  { %v1338_v41 = vadd.f32 %v1337_v39, %v2425_v47  ;;  %v2068_v43 = vpop.f32.mrb[17].mxu1  ;;  %v1681_v39 = vld [vmem:[%s2643_s3 + $0x18] sm:$0xff] }
 0x9b1   :  { %v1772_v43 = vld [vmem:[%s2645_s5] sm:$0xff] }
 0x9b2   :  { %v1344_v44 = vsel %vm197_vm2, %v1338_v41, -inf }
 0x9b3   :  { %1345 = vmax.xlane.f32.xlu1 %v1344_v44  ;;  %v1773_v44 = vld [vmem:[%s2645_s5 + $0x8] sm:$0xff] }
 0x9c4   :  { %1439 = vrot.lane.b32.xlu1 %v2401_v37, %s2284_s12 }
 0x9c8   :  { %1517 = vrot.lane.b32.xlu1 %v2491_v56, %s2270_s28 }
 0x9cc   :  { %1519 = vrot.lane.b32.xlu1 %v2493_v58, %s2270_s28 }
 0x9d0   :  { %1527 = vrot.lane.b32.xlu1 %v1181_v30, %s2285_s13 }
 0xa3c   :  { %v1343_v36 = vpop.xlane.xlu0 %1342 }
 0xa3d   :  { %v1347_v45 = vsub.f32 %v1260_v32, %v1343_v36  ;;  %v1678_v32 = vld [vmem:[%s2643_s3] sm:$0xff]  ;;  %v1774_v36 = vld [vmem:[%s2645_s5 + $0x10] sm:$0xff] }
 0xa3e   :  { %v2136_v34 = vpack.c.bf16 %v1679_v33, %v1678_v32 }
 0xa3f   :  { %v1349_v46 = vmul.f32 1.442695, %v1347_v45  ;;  %v2144_v45 = vpack.c.bf16 %v1773_v44, %v1772_v43 }
 0xa40   :  { %v1346_v48 = vpop.xlane.xlu1 %1345 }
 0xa41   :  { %2208 = vpow2.f32 %v1349_v46  ;;  %v1348_v47 = vsub.f32 %v1338_v41, %v1346_v48  ;;  %v2140_v41 = vpack.c.bf16 %v1681_v39, %v1680_v35  ;;  %v1775_v46 = vld [vmem:[%s2645_s5 + $0x18] sm:$0xff] }
 0xa42   :  { %v2148_v48 = vpack.c.bf16 %v1775_v46, %v1774_v36 }
 0xa43   :  { %v1351_v49 = vmul.f32 1.442695, %v1348_v47  ;;  %v1776_v47 = vld [vmem:[%s2645_s5 + $0x20] sm:$0xff] }
 0xa44   :  { %v1440_v50 = vpop.permute.xlu1 %1439 }
 0xa45   :  { %2210 = vpow2.f32 %v1351_v49  ;;  %2075 = vmatpush3.msra.mxu1 %v1440_v50  ;;  %v1777_v49 = vld [vmem:[%s2645_s5 + $0x28] sm:$0xff] }
 0xa46   :  { %2137 = vmatprep.subr.bf16.mxu1 %v2136_v34  ;;  %v2152_v50 = vpack.c.bf16 %v1777_v49, %v1776_v47 }
 0xa48   :  { %v1518_v8 = vpop.permute.xlu1 %1517 }
 0xa49   :  { %v1539_v11 = vsel %vm197_vm2, %v2457_v16, %v1518_v8 }
 0xa4b   :  { %v2209_v51 = vpop.eup %2208 }
 0xa4c   :  { %v1353_v37 = vsel %vm197_vm2, %v2209_v51, 0.0  ;;  %v1520_v9 = vpop.permute.xlu1 %1519 }
 0xa4d   :  { %1354 = vadd.xlane.f32.xlu0 %v1353_v37  ;;  %v1540_v42 = vsel %vm197_vm2, %v2459_v18, %v1520_v9 }
 0xa4f   :  { %v2211_v52 = vpop.eup %2210 }
 0xa50   :  { %v1356_v53 = vsel %vm197_vm2, %v2211_v52, 0.0  ;;  %v1528_v12 = vpop.permute.xlu1 %1527 }
 0xa51   :  { %1357 = vadd.xlane.f32.xlu0 %v1356_v53  ;;  %v1543_v17 = vsel %vm1541_vm5, %v1540_v42, %v1528_v12 }
 0xa67   :  { %1363 = vrot.lane.b32.xlu0 %v2404_v38, %s2284_s12  ;;  %v1548_v38 = vld [vmem:[%s2642_s2 + $0x8] sm:$0xff] }
 0xa68   :  { %v2128_v62 = vpack.c.bf16 %v1548_v38, %v1547_v61 }
 0xa6b   :  { %1525 = vrot.lane.b32.xlu0 %v1105_v28, %s2285_s13 }
 0xada   :  { %v1355_v54 = vpop.xlane.xlu0 %1354 }
 0xadb   :  { %2212 = vrcp.f32 %v1355_v54 }
 0xade   :  { %v1358_v55 = vpop.xlane.xlu0 %1357 }
 0xadf   :  { %2214 = vrcp.f32 %v1358_v55 }
 0xae2   :  { %v1364_v56 = vpop.permute.xlu0 %1363 }
 0xae3   :  { %2070 = vmatpush3.msra.mxu0 %v1364_v56 }
 0xae4   :  { %2129 = vmatprep.subr.bf16.mxu0 %v2128_v62 }
 0xae5   :  { %v2213_v57 = vpop.eup %2212 }
 0xae6   :  { %v1361_v58 = vmul.f32 %v2213_v57, %v2209_v51  ;;  %v1526_v10 = vpop.permute.xlu0 %1525  ;;  %v1920_v57 = vld [vmem:[%s2649_s9] ss:$0 sm:$0xff] }
 0xae7   :  { %v1542_v13 = vsel %vm1541_vm5, %v1539_v11, %v1526_v10 }
 0xae8   :  { %2072 = vmatmul.mubr.msk.f32.vlgmr.msra.gmra.mrb[12].mxu0 %vm197_vm2, %v1361_v58 }
 0xae9   :  { %v2215_v59 = vpop.eup %2214  ;;  %2131 = vmatpush3.bf16.msra.mxu0 %v2128_v62 }
 0xaea   :  { %v1362_v60 = vmul.f32 %v2215_v59, %v2211_v52  ;;  %2133 = vmatprep.subr.bf16.mxu0 %v2132_v3  ;;  %v1921_v59 = vld [vmem:[%s2650_s10] ss:$0 sm:$0xff] }
 0xaec   :  { %2077 = vmatmul.mubr.msk.f32.vlgmr.msra.gmra.mrb[18].mxu1 %vm197_vm2, %v1362_v60 }
 0xaed   :  { %2135 = vmatpush3.bf16.msra.mxu0 %v2132_v3  ;;  %2139 = vmatpush3.bf16.msra.mxu1 %v2136_v34  ;;  %v1778_v3 = vld [vmem:[%s2645_s5 + $0x30] sm:$0xff] }
 0xaee   :  { %2141 = vmatprep.subr.bf16.mxu1 %v2140_v41  ;;  %2145 = vmatprep.subr.bf16.mxu0 %v2144_v45 }
 0xaf1   :  { %2143 = vmatpush3.bf16.msra.mxu1 %v2140_v41 }
 0xbbb   :  { %v1435_v4 = vpop.f32.mrb[12].mxu0 }
 0xbbc   :  { %1533 = vrot.lane.b32.xlu0 %v1435_v4, %s2286_s21  ;;  %v2073_v5 = vpop.f32.mrb[13].mxu0  ;;  %v1779_v4 = vld [vmem:[%s2645_s5 + $0x38] sm:$0xff]  ;;  %s2287_s5 = smov [#allocation5]  }
 0xbbd   :  { %v2156_v5 = vpack.c.bf16 %v1779_v4, %v1778_v3  ;;  %s1878_s26 = sshll.u32 %s2287_s5, 4  ;;  %s1879_s26 = int_to_ptr.vmem [resolvable:$true] %s1878_s26 }
 0xbbe   :  { %p2247_p9 = scmp.lt.s32.totalorder %s1879_s26, %s1879_s26 }
 0xbbf   :  { %v1511_v6 = vpop.f32.mrb[18].mxu1 }
 0xbc0   :  { %1535 = vrot.lane.b32.xlu1 %v1511_v6, %s2286_s21  ;;  %v2078_v7 = vpop.f32.mrb[19].mxu1  ;;  %v1922_v6 = vld [vmem:[%s2644_s4] ss:$0 sm:$0xff]  ;;  %s2242_s4 = scalar_lea.vmem %s1879_s26, 256 }
 0xbc1   :  { %p2243_p8 = scmp.ne.s32.totalorder %s1879_s26, %s2242_s4  ;;  %p2248_p10 = scmp.lt.s32.totalorder %s2242_s4, %s2242_s4 }
 0xbc3   :  { %p2249_p11 = por %p2248_p10, %p2247_p9 }
 0xbc5   :  { %p2250_p12 = pnand %p2249_p11, %p2243_p8 }
 0xc2e   :  { %v1534_v14 = vpop.permute.xlu0 %1533 }
 0xc2f   :  { %v1545_v15 = vsel %vm1544_vm4, %v1542_v13, %v1534_v14  ;;  %v1925_v13 = vld [vmem:[%s2646_s6] ss:$0 sm:$0xff] }
 0xc30   :  { %2087 = vmatprep.mubr.msk.f32.mxu0 %vm57_vm0, %v1545_v15 }
 0xc32   :  { %v1536_v19 = vpop.permute.xlu1 %1535 }
 0xc33   :  { %v1546_v20 = vsel %vm1544_vm4, %v1543_v17, %v1536_v19 }
 0xc34   :  { %2088 = vmatmul.mubr.msk.f32.vlgmr.msra.gmra.mrb[14].mxu0 %vm57_vm0, %v1546_v20 }
 0xc35   :  { %2147 = vmatpush3.bf16.msra.mxu0 %v2144_v45 }
 0xc36   :  { %2149 = vmatprep.subr.bf16.mxu0 %v2148_v48 }
 0xc39   :  { %2151 = vmatpush3.bf16.msra.mxu0 %v2148_v48 }
 0xc3a   :  { %2153 = vmatprep.subr.bf16.mxu0 %v2152_v50 }
 0xc3d   :  { %2155 = vmatpush3.bf16.msra.mxu0 %v2152_v50 }
 0xc3e   :  { %2157 = vmatprep.subr.bf16.mxu0 %v2156_v5 }
 0xc41   :  { %2159 = vmatpush3.bf16.msra.mxu0 %v2156_v5 }
 0xd07   :  { %v2089_v21 = vpop.f32.mrb[14].mxu0 }
 0xd08   :  { %v2558_v22 = vadd.f32 %v2089_v21, %v2365_v1  ;;  %v1623_v16 = vpop.f32.mrb[15].mxu0 }
 0xd09   :  { %v2561_v23 = vadd.f32 %v1623_v16, %v2363_v0 }
 0xd0a   :  { %v1639_v24 = vsel %vm57_vm0, %v2558_v22, 0.0 }
 0xd0b   :  { %1640 = vadd.xlane.f32.xlu1 %v1639_v24  ;;  %v1636_v18 = vsel %vm57_vm0, %v2561_v23, 0.0 }
 0xd0c   :  { %1637 = vadd.xlane.f32.xlu0 %v1636_v18 }
 0xd98   :  { %v1641_v25 = vpop.xlane.xlu1 %1640 }
 0xd99   :  { %v1643_v26 = vmul.f32 0.03125, %v1641_v25  ;;  %v1638_v40 = vpop.xlane.xlu0 %1637 }
 0xd9a   :  { %v1642_v27 = vmul.f32 0.03125, %v1638_v40 }
 0xd9b   :  { %v1645_v28 = vsub.f32 %v2558_v22, %v1643_v26 }
 0xd9c   :  { %v1644_v1 = vsub.f32 %v2561_v23, %v1642_v27 }
 0xd9d   :  { %v1647_v30 = vmul.f32 %v1645_v28, %v1645_v28 }
 0xd9e   :  { %v1646_v29 = vmul.f32 %v1644_v1, %v1644_v1 }
 0xd9f   :  { %v1651_v31 = vsel %vm57_vm0, %v1647_v30, 0.0 }
 0xda0   :  { %v1648_v0 = vsel %vm57_vm0, %v1646_v29, 0.0 }
 0xda1   :  { %1649 = vadd.xlane.f32.xlu0 %v1648_v0 }
 0xda5   :  { %1652 = vadd.xlane.f32.xlu0 %v1651_v31 }
 0xe2e   :  { %v1650_v51 = vpop.xlane.xlu0 %1649 }
 0xe2f   :  { %v1654_v37 = vmul.f32 0.03125, %v1650_v51 }
 0xe31   :  { %v1656_v52 = vadd.f32 1e-05, %v1654_v37 }
 0xe32   :  { %v1653_v53 = vpop.xlane.xlu0 %1652 }
 0xe33   :  { %2216 = vrsqrt.f32 %v1656_v52  ;;  %v1655_v54 = vmul.f32 0.03125, %v1653_v53 }
 0xe35   :  { %v1657_v55 = vadd.f32 1e-05, %v1655_v54 }
 0xe37   :  { %2218 = vrsqrt.f32 %v1657_v55 }
 0xe3d   :  { %v2217_v56 = vpop.eup %2216 }
 0xe3e   :  { %v1660_v58 = vmul.f32 %v2217_v56, %v1644_v1 }
 0xe40   :  { %v1668_v60 = vmul.f32 %v1920_v57, %v1660_v58 }
 0xe41   :  { %v2219_v61 = vpop.eup %2218 }
 0xe42   :  { %v1661_v38 = vmul.f32 %v2219_v61, %v1645_v28  ;;  %v1676_v62 = vadd.f32 %v1921_v59, %v1668_v60 }
 0xe44   :  { %v1669_v63 = vmul.f32 %v1920_v57, %v1661_v38  ;;  %2098 = vmatprep.mubr.msk.f32.mxu1 %vm57_vm0, %v1676_v62 }
 0xe46   :  { %v1677_v2 = vadd.f32 %v1921_v59, %v1669_v63 }
 0xe48   :  { %2099 = vmatmul.mubr.msk.f32.vlgmr.msra.gmra.mrb[20].mxu1 %vm57_vm0, %v1677_v2 }
 0xf1b   :  { %v2100_v7 = vpop.f32.mrb[20].mxu1 }
 0xf1c   :  { %v1767_v8 = vadd.f32 %v2100_v7, %v1922_v6  ;;  %v1761_v9 = vpop.f32.mrb[21].mxu1 }
 0xf1d   :  { %v1762_v10 = vadd.f32 %v1922_v6, %v1761_v9 }
 0xf1e   :  { %v1771_v12 = vmax.f32 %v1767_v8, 0.0 }
 0xf1f   :  { %v1770_v11 = vmax.f32 %v1762_v10, 0.0 }
 0xf21   :  { %2117 = vmatprep.mubr.msk.f32.mxu0 %vm1787_vm6, %v1770_v11 }
 0xf22   :  { %2118 = vmatmul.mubr.msk.f32.vlgmr.msra.gmra.mrb[16].mxu0 %vm1787_vm6, %v1771_v12 }
 0xff5   :  { %v2119_v14 = vpop.f32.mrb[16].mxu0 }
 0xff6   :  { %v1866_v15 = vadd.f32 %v2119_v14, %v1925_v13  ;;  %v1860_v42 = vpop.f32.mrb[17].mxu0 }
 0xff7   :  { %v1861_v17 = vadd.f32 %v1925_v13, %v1860_v42 }
 0xff8   :  { %v1870_v19 = vadd.f32 %v1866_v15, %v2558_v22 }
 0xff9   :  { %v1869_v20 = vadd.f32 %v1861_v17, %v2561_v23 }
 0xffa   :  { %1872 = vst.msk [vmem:[#allocation5 + $0x8] sm:$0xff] %vm57_vm0, %v1870_v19 }
 0xffb   :  { %1871 = vst.msk [vmem:[#allocation5] sm:$0xff] %vm57_vm0, %v1869_v20 }
 0xffc   :  { %2253 = shalt.err (!%p2250_p12)
}
 0xffd   :  { %s2254_s30 = scalar_lea.hbm %s2651_s11, 256 }
 0xffe   :  { %p2255_p13 = scmp.ne.s32.totalorder %s2651_s11, %s2254_s30  ;;  %p2258_p0 = scmp.lt.u32.totalorder %s2254_s30, %s2651_s11 }
0x1000   :  { %p2260_p1 = pnand %p2258_p0, %p2255_p13 }
0x1002   :  { %2263 = shalt.err (!%p2260_p1)
}
0x1003   :  { %1884 = dma.vmem_to_hbm [thread:$0]  %s1879_s26, 256, %s2651_s11, [#allocation4], %s2269_s27, %s2269_s27, %s2270_s28  }
0x1004   :  { %2266 = dma.done.wait [#allocation4], 256  }
0x1005   :  { %2267 = vsyncadd [#allocation4], 4294967040 }
0x1006   :  { %1888 = vsyncpa [#allocation3], 1 }
0x1007   :  { %1889 = vsyncpa [#allocation4], 1 }

</bundles_post_ra>
